<compile_context>
chip_gen: v7x
topology: tpu7x:2x2x1
jax: 0.10.0
libtpu: 0.0.40
codegen_flags: <defaults>
</compile_context>

<pallas_src>
import jax
import jax.numpy as jnp
from jax.experimental import pallas as pl
from jax.experimental.pallas import tpu as pltpu


# -----------------------------------------------------------------------------
# Fused Block kernel: one grid step == one batch element.
# -----------------------------------------------------------------------------
def _block_kernel(
    x_ref,                                          # (1, C_in, N)
    tw1_ref, tb1_ref, tw2_ref, tb2_ref,             # TNet 1x1 conv stack
    fw1t_ref, fb1_ref, fw2t_ref, fb2e_ref,          # TNet FC head (w pre-transposed, bias2 += identity)
    l_ref, r_ref,                                   # flat -> (M, M) unflatten operators
    mw1_ref, mb1_ref, mw2_ref, mb2_ref,             # point-MLP 1x1 conv stack
    t_ref, xt_ref, y1_ref, y2_ref,                  # outputs
):
    f32 = jnp.float32
    x = x_ref[0]                                                        # (C_in, N)

    # ---- TNet: 1x1 conv stack (weights on the left keeps lane dim = N) ----
    h = jnp.dot(tw1_ref[...], x, preferred_element_type=f32) + tb1_ref[...]
    h = jnp.maximum(h, 0.0)                                             # (32, N)
    h = jnp.dot(tw2_ref[...], h, preferred_element_type=f32) + tb2_ref[...]
    h = jnp.maximum(h, 0.0)                                             # (64, N)

    # ---- global max-pool over points (lane reduce) ----
    g = jnp.max(h, axis=-1, keepdims=True)                              # (64, 1)

    # ---- FC head ----
    # FC1 as broadcast-multiply + sublane-sum: avoids transposing g and any
    # degenerate (N=1) matmul.
    z = jnp.sum(fw1t_ref[...] * g, axis=0, keepdims=True) + fb1_ref[...]   # (1, 32)
    z = jnp.maximum(z, 0.0)
    # FC2: identity matrix already folded into the bias on the host.
    tf = jnp.dot(z, fw2t_ref[...], preferred_element_type=f32) + fb2e_ref[...]  # (1, M*M)

    # ---- unflatten (1, M*M) -> (M, M) with constant selection matmuls ----
    # t[i, j] = sum_a L[i, a] * tf[a] * R[a, j] = tf[M*i + j]
    t = jnp.dot(l_ref[...] * tf, r_ref[...], preferred_element_type=f32)        # (M, M)
    t_ref[0] = t.astype(t_ref.dtype)

    # ---- apply transform: x_t = t @ x ----
    xt = jnp.dot(t, x, preferred_element_type=f32)                       # (C_in, N)
    xt_ref[0] = xt.astype(xt_ref.dtype)

    # ---- point MLP (ReLU after every layer), all outputs returned ----
    y1 = jnp.dot(mw1_ref[...], xt, preferred_element_type=f32) + mb1_ref[...]
    y1 = jnp.maximum(y1, 0.0)                                            # (32, N)
    y1_ref[0] = y1.astype(y1_ref.dtype)

    y2 = jnp.dot(mw2_ref[...], y1, preferred_element_type=f32) + mb2_ref[...]
    y2 = jnp.maximum(y2, 0.0)                                            # (64, N)
    y2_ref[0] = y2.astype(y2_ref.dtype)


def _whole(arr):
    """BlockSpec for a small 2-D parameter kept fully resident in VMEM."""
    assert arr.ndim == 2
    return pl.BlockSpec(arr.shape, lambda i: (0, 0))


def block_forward(params, x):
    """Mirrors Block.forward: returns [t, x_t, [y_1, ..., y_out]]."""
    B, c_in, n = x.shape
    m = params["mat_size"]
    (tw1, tb1), (tw2, tb2) = params["tnet_convs"]
    (fw1, fb1), (fw2, fb2) = params["tnet_fcs"]
    (mw1, mb1), (mw2, mb2) = params["mlp_convs"]

    h1 = tw1.shape[0]          # 32
    h2 = tw2.shape[0]          # 64
    fh = fw1.shape[0]          # 32
    mm = fw2.shape[0]          # m*m
    d1 = mw1.shape[0]          # 32
    d2 = mw2.shape[0]          # 64

    # Host-side layout plumbing (free): pre-transpose FC weights, fold the
    # identity matrix into the FC2 bias, build the unflatten operators, and
    # shape biases as column/row vectors so no per-step re-broadcast is needed.
    a = jnp.arange(mm, dtype=jnp.int32)
    L = (a[None, :] // m == jnp.arange(m, dtype=jnp.int32)[:, None]).astype(jnp.float32)  # (m, m*m)
    R = (a[:, None] % m == jnp.arange(m, dtype=jnp.int32)[None, :]).astype(jnp.float32)   # (m*m, m)

    operands = [
        x,
        tw1, tb1.reshape(h1, 1), tw2, tb2.reshape(h2, 1),
        fw1.T, fb1.reshape(1, fh), fw2.T,
        (fb2 + params["eye_flat"]).reshape(1, mm),
        L, R,
        mw1, mb1.reshape(d1, 1), mw2, mb2.reshape(d2, 1),
    ]

    in_specs = [pl.BlockSpec((1, c_in, n), lambda i: (i, 0, 0))]
    in_specs += [_whole(op) for op in operands[1:]]

    out_shape = (
        jax.ShapeDtypeStruct((B, m, m), jnp.float32),
        jax.ShapeDtypeStruct((B, c_in, n), jnp.float32),
        jax.ShapeDtypeStruct((B, d1, n), jnp.float32),
        jax.ShapeDtypeStruct((B, d2, n), jnp.float32),
    )
    out_specs = (
        pl.BlockSpec((1, m, m), lambda i: (i, 0, 0)),
        pl.BlockSpec((1, c_in, n), lambda i: (i, 0, 0)),
        pl.BlockSpec((1, d1, n), lambda i: (i, 0, 0)),
        pl.BlockSpec((1, d2, n), lambda i: (i, 0, 0)),
    )

    t, x_t, y1, y2 = pl.pallas_call(
        _block_kernel,
        out_shape=out_shape,
        grid=(B,),
        in_specs=in_specs,
        out_specs=out_specs,
        compiler_params=pltpu.CompilerParams(
            dimension_semantics=("parallel",)),   # batch elements -> both TCs on v7x
    )(*operands)

    return [t, x_t, [y1, y2]]


# -----------------------------------------------------------------------------
# Parameter init (same deterministic scheme as before)
# -----------------------------------------------------------------------------
def init_params(key, in_features, mat_size):
    tnet_dims = [in_features, 32, 64]
    fc_dims = [tnet_dims[-1], 32, mat_size * mat_size]
    mlp_dims = [in_features, 32, 64]

    keys = jax.random.split(key, 16)
    ki = iter(range(16))

    def dense(kidx, out_d, in_d):
        scale = 1.0 / jnp.sqrt(jnp.float32(in_d))
        w = jax.random.normal(keys[kidx], (out_d, in_d), jnp.float32) * scale
        b = jax.random.normal(keys[kidx + 8], (out_d,), jnp.float32) * 0.01
        return w, b

    params = {
        "mat_size": mat_size,
        "tnet_convs": [
            dense(next(ki), tnet_dims[i + 1], tnet_dims[i])
            for i in range(len(tnet_dims) - 1)
        ],
        "tnet_fcs": [
            dense(next(ki), fc_dims[i + 1], fc_dims[i])
            for i in range(len(fc_dims) - 1)
        ],
        "mlp_convs": [
            dense(next(ki), mlp_dims[i + 1], mlp_dims[i])
            for i in range(len(mlp_dims) - 1)
        ],
        "eye_flat": jnp.eye(mat_size, dtype=jnp.float32).reshape(-1),
    }
    return params


# -----------------------------------------------------------------------------
# Pure-JAX reference (for correctness check)
# -----------------------------------------------------------------------------
def _ref_pconv(x, w, b, relu=True):
    y = jnp.einsum("oc,bcn->bon", w, x) + b[None, :, None]
    return jnp.maximum(y, 0.0) if relu else y


def ref_block_forward(params, x):
    h = x
    for w, b in params["tnet_convs"]:
        h = _ref_pconv(h, w, b)
    g = jnp.max(h, axis=-1)
    (w1, b1), (w2, b2) = params["tnet_fcs"]
    hh = jnp.maximum(g @ w1.T + b1, 0.0)
    t_flat = hh @ w2.T + b2 + params["eye_flat"][None, :]
    m = params["mat_size"]
    t = t_flat.reshape(x.shape[0], m, m)
    x_t = jnp.einsum("bij,bjn->bin", t, x)
    ys = []
    hh2 = x_t
    for w, b in params["mlp_convs"]:
        hh2 = _ref_pconv(hh2, w, b)
        ys.append(hh2)
    return [t, x_t, ys]


# -----------------------------------------------------------------------------
if __name__ == "__main__":
    B, C_IN, N_PTS = 2, 4, 128
    MAT_SIZE = C_IN  # TNet transform acts on the input feature dimension

    key = jax.random.PRNGKey(0)
    pkey, xkey = jax.random.split(key)
    params = init_params(pkey, C_IN, MAT_SIZE)
    x = jax.random.normal(xkey, (B, C_IN, N_PTS), jnp.float32)

    t, x_t, ys = block_forward(params, x)
    jax.block_until_ready(t)
    jax.block_until_ready(x_t)
    for y in ys:
        jax.block_until_ready(y)

    # Correctness check against a pure-JAX reference.
    t_r, x_t_r, ys_r = ref_block_forward(params, x)
    assert t.shape == (B, MAT_SIZE, MAT_SIZE)
    assert x_t.shape == x.shape
    assert jnp.allclose(t, t_r, rtol=1e-4, atol=1e-4)
    assert jnp.allclose(x_t, x_t_r, rtol=1e-4, atol=1e-4)
    for y, y_r in zip(ys, ys_r):
        assert jnp.allclose(y, y_r, rtol=1e-4, atol=1e-4)

    print("KERNEL_OK")
</pallas_src>

<mosaic_0001>
module attributes {stable_mosaic.version = 11 : i64} {
  func.func @_block_kernel(%arg0: i32, %arg1: memref<1x4x128xf32, #tpu.memory_space<vmem>>, %arg2: memref<32x4xf32, #tpu.memory_space<vmem>>, %arg3: memref<32x1xf32, #tpu.memory_space<vmem>>, %arg4: memref<64x32xf32, #tpu.memory_space<vmem>>, %arg5: memref<64x1xf32, #tpu.memory_space<vmem>>, %arg6: memref<64x32xf32, #tpu.memory_space<vmem>>, %arg7: memref<1x32xf32, #tpu.memory_space<vmem>>, %arg8: memref<32x16xf32, #tpu.memory_space<vmem>>, %arg9: memref<1x16xf32, #tpu.memory_space<vmem>>, %arg10: memref<4x16xf32, #tpu.memory_space<vmem>>, %arg11: memref<16x4xf32, #tpu.memory_space<vmem>>, %arg12: memref<32x4xf32, #tpu.memory_space<vmem>>, %arg13: memref<32x1xf32, #tpu.memory_space<vmem>>, %arg14: memref<64x32xf32, #tpu.memory_space<vmem>>, %arg15: memref<64x1xf32, #tpu.memory_space<vmem>>, %arg16: memref<1x4x4xf32, #tpu.memory_space<vmem>>, %arg17: memref<1x4x128xf32, #tpu.memory_space<vmem>>, %arg18: memref<1x32x128xf32, #tpu.memory_space<vmem>>, %arg19: memref<1x64x128xf32, #tpu.memory_space<vmem>>) attributes {dimension_semantics = [#tpu.dimension_semantics<parallel>], iteration_bounds = array<i64: 2>, scalar_prefetch = 0 : i64, scratch_operands = 0 : i64, tpu.core_type = #tpu.core_type<tc>, window_params = [{transform_indices = @transform_0, window_bounds = array<i64: 1, 4, 128>}, {pipeline_mode = #tpu.pipeline_mode<synchronous>, transform_indices = @transform_1, window_bounds = array<i64: 32, 4>}, {pipeline_mode = #tpu.pipeline_mode<synchronous>, transform_indices = @transform_2, window_bounds = array<i64: 32, 1>}, {pipeline_mode = #tpu.pipeline_mode<synchronous>, transform_indices = @transform_3, window_bounds = array<i64: 64, 32>}, {pipeline_mode = #tpu.pipeline_mode<synchronous>, transform_indices = @transform_4, window_bounds = array<i64: 64, 1>}, {pipeline_mode = #tpu.pipeline_mode<synchronous>, transform_indices = @transform_5, window_bounds = array<i64: 64, 32>}, {pipeline_mode = #tpu.pipeline_mode<synchronous>, transform_indices = @transform_6, window_bounds = array<i64: 1, 32>}, {pipeline_mode = #tpu.pipeline_mode<synchronous>, transform_indices = @transform_7, window_bounds = array<i64: 32, 16>}, {pipeline_mode = #tpu.pipeline_mode<synchronous>, transform_indices = @transform_8, window_bounds = array<i64: 1, 16>}, {pipeline_mode = #tpu.pipeline_mode<synchronous>, transform_indices = @transform_9, window_bounds = array<i64: 4, 16>}, {pipeline_mode = #tpu.pipeline_mode<synchronous>, transform_indices = @transform_10, window_bounds = array<i64: 16, 4>}, {pipeline_mode = #tpu.pipeline_mode<synchronous>, transform_indices = @transform_11, window_bounds = array<i64: 32, 4>}, {pipeline_mode = #tpu.pipeline_mode<synchronous>, transform_indices = @transform_12, window_bounds = array<i64: 32, 1>}, {pipeline_mode = #tpu.pipeline_mode<synchronous>, transform_indices = @transform_13, window_bounds = array<i64: 64, 32>}, {pipeline_mode = #tpu.pipeline_mode<synchronous>, transform_indices = @transform_14, window_bounds = array<i64: 64, 1>}, {transform_indices = @transform_15, window_bounds = array<i64: 1, 4, 4>}, {transform_indices = @transform_16, window_bounds = array<i64: 1, 4, 128>}, {transform_indices = @transform_17, window_bounds = array<i64: 1, 32, 128>}, {transform_indices = @transform_18, window_bounds = array<i64: 1, 64, 128>}]} {
    %c0 = arith.constant 0 : index
    %c0_0 = arith.constant 0 : index
    %c0_1 = arith.constant 0 : index
    %0 = vector.load %arg1[%c0, %c0_0, %c0_1] : memref<1x4x128xf32, #tpu.memory_space<vmem>>, vector<1x4x128xf32>
    %1 = vector.shape_cast %0 : vector<1x4x128xf32> to vector<4x128xf32>
    %c0_2 = arith.constant 0 : index
    %c0_3 = arith.constant 0 : index
    %2 = vector.load %arg2[%c0_2, %c0_3] : memref<32x4xf32, #tpu.memory_space<vmem>>, vector<32x4xf32>
    %cst = arith.constant dense<0.000000e+00> : vector<32x128xf32>
    %3 = tpu.matmul %2, %1, %cst {dimension_numbers = #tpu.dot_dimension_numbers<[1], [0], [0], [1], [0, 0, 1, 1], [], []>} : vector<32x4xf32>, vector<4x128xf32>, vector<32x128xf32> -> vector<32x128xf32>
    %c0_4 = arith.constant 0 : index
    %c0_5 = arith.constant 0 : index
    %4 = vector.load %arg3[%c0_4, %c0_5] : memref<32x1xf32, #tpu.memory_space<vmem>>, vector<32x1xf32>
    %5 = vector.broadcast %4 : vector<32x1xf32> to vector<32x128xf32>
    %6 = arith.addf %3, %5 : vector<32x128xf32>
    %cst_6 = arith.constant 0.000000e+00 : f32
    %7 = vector.broadcast %cst_6 : f32 to vector<32x128xf32>
    %8 = arith.maximumf %6, %7 : vector<32x128xf32>
    %c0_7 = arith.constant 0 : index
    %c0_8 = arith.constant 0 : index
    %9 = vector.load %arg4[%c0_7, %c0_8] : memref<64x32xf32, #tpu.memory_space<vmem>>, vector<64x32xf32>
    %cst_9 = arith.constant dense<0.000000e+00> : vector<64x128xf32>
    %10 = tpu.matmul %9, %8, %cst_9 {dimension_numbers = #tpu.dot_dimension_numbers<[1], [0], [0], [1], [0, 0, 1, 1], [], []>} : vector<64x32xf32>, vector<32x128xf32>, vector<64x128xf32> -> vector<64x128xf32>
    %c0_10 = arith.constant 0 : index
    %c0_11 = arith.constant 0 : index
    %11 = vector.load %arg5[%c0_10, %c0_11] : memref<64x1xf32, #tpu.memory_space<vmem>>, vector<64x1xf32>
    %12 = vector.broadcast %11 : vector<64x1xf32> to vector<64x128xf32>
    %13 = arith.addf %10, %12 : vector<64x128xf32>
    %cst_12 = arith.constant 0.000000e+00 : f32
    %14 = vector.broadcast %cst_12 : f32 to vector<64x128xf32>
    %15 = arith.maximumf %13, %14 : vector<64x128xf32>
    %cst_13 = arith.constant dense<0xFF800000> : vector<64xf32>
    %16 = vector.multi_reduction <maximumf>, %15, %cst_13 [1] : vector<64x128xf32> to vector<64xf32>
    %17 = vector.shape_cast %16 : vector<64xf32> to vector<64x1xf32>
    %c0_14 = arith.constant 0 : index
    %c0_15 = arith.constant 0 : index
    %18 = vector.load %arg6[%c0_14, %c0_15] : memref<64x32xf32, #tpu.memory_space<vmem>>, vector<64x32xf32>
    %19 = vector.broadcast %17 : vector<64x1xf32> to vector<64x32xf32>
    %20 = arith.mulf %18, %19 : vector<64x32xf32>
    %cst_16 = arith.constant dense<0.000000e+00> : vector<32xf32>
    %21 = vector.multi_reduction <add>, %20, %cst_16 [0] : vector<64x32xf32> to vector<32xf32>
    %22 = vector.shape_cast %21 : vector<32xf32> to vector<1x32xf32>
    %c0_17 = arith.constant 0 : index
    %c0_18 = arith.constant 0 : index
    %23 = vector.load %arg7[%c0_17, %c0_18] : memref<1x32xf32, #tpu.memory_space<vmem>>, vector<1x32xf32>
    %24 = arith.addf %22, %23 : vector<1x32xf32>
    %cst_19 = arith.constant 0.000000e+00 : f32
    %25 = vector.broadcast %cst_19 : f32 to vector<1x32xf32>
    %26 = arith.maximumf %24, %25 : vector<1x32xf32>
    %c0_20 = arith.constant 0 : index
    %c0_21 = arith.constant 0 : index
    %27 = vector.load %arg8[%c0_20, %c0_21] : memref<32x16xf32, #tpu.memory_space<vmem>>, vector<32x16xf32>
    %cst_22 = arith.constant dense<0.000000e+00> : vector<1x16xf32>
    %28 = tpu.matmul %26, %27, %cst_22 {dimension_numbers = #tpu.dot_dimension_numbers<[1], [0], [0], [1], [0, 0, 1, 1], [], []>} : vector<1x32xf32>, vector<32x16xf32>, vector<1x16xf32> -> vector<1x16xf32>
    %c0_23 = arith.constant 0 : index
    %c0_24 = arith.constant 0 : index
    %29 = vector.load %arg9[%c0_23, %c0_24] : memref<1x16xf32, #tpu.memory_space<vmem>>, vector<1x16xf32>
    %30 = arith.addf %28, %29 : vector<1x16xf32>
    %c0_25 = arith.constant 0 : index
    %c0_26 = arith.constant 0 : index
    %31 = vector.load %arg10[%c0_25, %c0_26] : memref<4x16xf32, #tpu.memory_space<vmem>>, vector<4x16xf32>
    %32 = vector.broadcast %30 : vector<1x16xf32> to vector<4x16xf32>
    %33 = arith.mulf %31, %32 : vector<4x16xf32>
    %c0_27 = arith.constant 0 : index
    %c0_28 = arith.constant 0 : index
    %34 = vector.load %arg11[%c0_27, %c0_28] : memref<16x4xf32, #tpu.memory_space<vmem>>, vector<16x4xf32>
    %cst_29 = arith.constant dense<0.000000e+00> : vector<4x4xf32>
    %35 = tpu.matmul %33, %34, %cst_29 {dimension_numbers = #tpu.dot_dimension_numbers<[1], [0], [0], [1], [0, 0, 1, 1], [], []>} : vector<4x16xf32>, vector<16x4xf32>, vector<4x4xf32> -> vector<4x4xf32>
    %c0_30 = arith.constant 0 : index
    %c0_31 = arith.constant 0 : index
    %c0_32 = arith.constant 0 : index
    %36 = vector.load %arg16[%c0_30, %c0_31, %c0_32] : memref<1x4x4xf32, #tpu.memory_space<vmem>>, vector<1x4x4xf32>
    %37 = vector.shape_cast %36 : vector<1x4x4xf32> to vector<4x4xf32>
    %38 = vector.shape_cast %35 : vector<4x4xf32> to vector<1x4x4xf32>
    tpu.vector_store %arg16[%c0_30, %c0_31, %c0_32], %38 {strides = array<i32>} : memref<1x4x4xf32, #tpu.memory_space<vmem>>, vector<1x4x4xf32>,
    %cst_33 = arith.constant dense<0.000000e+00> : vector<4x128xf32>
    %39 = tpu.matmul %35, %1, %cst_33 {dimension_numbers = #tpu.dot_dimension_numbers<[1], [0], [0], [1], [0, 0, 1, 1], [], []>} : vector<4x4xf32>, vector<4x128xf32>, vector<4x128xf32> -> vector<4x128xf32>
    %c0_34 = arith.constant 0 : index
    %c0_35 = arith.constant 0 : index
    %c0_36 = arith.constant 0 : index
    %40 = vector.load %arg17[%c0_34, %c0_35, %c0_36] : memref<1x4x128xf32, #tpu.memory_space<vmem>>, vector<1x4x128xf32>
    %41 = vector.shape_cast %40 : vector<1x4x128xf32> to vector<4x128xf32>
    %42 = vector.shape_cast %39 : vector<4x128xf32> to vector<1x4x128xf32>
    tpu.vector_store %arg17[%c0_34, %c0_35, %c0_36], %42 {strides = array<i32>} : memref<1x4x128xf32, #tpu.memory_space<vmem>>, vector<1x4x128xf32>,
    %c0_37 = arith.constant 0 : index
    %c0_38 = arith.constant 0 : index
    %43 = vector.load %arg12[%c0_37, %c0_38] : memref<32x4xf32, #tpu.memory_space<vmem>>, vector<32x4xf32>
    %cst_39 = arith.constant dense<0.000000e+00> : vector<32x128xf32>
    %44 = tpu.matmul %43, %39, %cst_39 {dimension_numbers = #tpu.dot_dimension_numbers<[1], [0], [0], [1], [0, 0, 1, 1], [], []>} : vector<32x4xf32>, vector<4x128xf32>, vector<32x128xf32> -> vector<32x128xf32>
    %c0_40 = arith.constant 0 : index
    %c0_41 = arith.constant 0 : index
    %45 = vector.load %arg13[%c0_40, %c0_41] : memref<32x1xf32, #tpu.memory_space<vmem>>, vector<32x1xf32>
    %46 = vector.broadcast %45 : vector<32x1xf32> to vector<32x128xf32>
    %47 = arith.addf %44, %46 : vector<32x128xf32>
    %cst_42 = arith.constant 0.000000e+00 : f32
    %48 = vector.broadcast %cst_42 : f32 to vector<32x128xf32>
    %49 = arith.maximumf %47, %48 : vector<32x128xf32>
    %c0_43 = arith.constant 0 : index
    %c0_44 = arith.constant 0 : index
    %c0_45 = arith.constant 0 : index
    %50 = vector.load %arg18[%c0_43, %c0_44, %c0_45] : memref<1x32x128xf32, #tpu.memory_space<vmem>>, vector<1x32x128xf32>
    %51 = vector.shape_cast %50 : vector<1x32x128xf32> to vector<32x128xf32>
    %52 = vector.shape_cast %49 : vector<32x128xf32> to vector<1x32x128xf32>
    tpu.vector_store %arg18[%c0_43, %c0_44, %c0_45], %52 {strides = array<i32>} : memref<1x32x128xf32, #tpu.memory_space<vmem>>, vector<1x32x128xf32>,
    %c0_46 = arith.constant 0 : index
    %c0_47 = arith.constant 0 : index
    %53 = vector.load %arg14[%c0_46, %c0_47] : memref<64x32xf32, #tpu.memory_space<vmem>>, vector<64x32xf32>
    %cst_48 = arith.constant dense<0.000000e+00> : vector<64x128xf32>
    %54 = tpu.matmul %53, %49, %cst_48 {dimension_numbers = #tpu.dot_dimension_numbers<[1], [0], [0], [1], [0, 0, 1, 1], [], []>} : vector<64x32xf32>, vector<32x128xf32>, vector<64x128xf32> -> vector<64x128xf32>
    %c0_49 = arith.constant 0 : index
    %c0_50 = arith.constant 0 : index
    %55 = vector.load %arg15[%c0_49, %c0_50] : memref<64x1xf32, #tpu.memory_space<vmem>>, vector<64x1xf32>
    %56 = vector.broadcast %55 : vector<64x1xf32> to vector<64x128xf32>
    %57 = arith.addf %54, %56 : vector<64x128xf32>
    %cst_51 = arith.constant 0.000000e+00 : f32
    %58 = vector.broadcast %cst_51 : f32 to vector<64x128xf32>
    %59 = arith.maximumf %57, %58 : vector<64x128xf32>
    %c0_52 = arith.constant 0 : index
    %c0_53 = arith.constant 0 : index
    %c0_54 = arith.constant 0 : index
    %60 = vector.load %arg19[%c0_52, %c0_53, %c0_54] : memref<1x64x128xf32, #tpu.memory_space<vmem>>, vector<1x64x128xf32>
    %61 = vector.shape_cast %60 : vector<1x64x128xf32> to vector<64x128xf32>
    %62 = vector.shape_cast %59 : vector<64x128xf32> to vector<1x64x128xf32>
    tpu.vector_store %arg19[%c0_52, %c0_53, %c0_54], %62 {strides = array<i32>} : memref<1x64x128xf32, #tpu.memory_space<vmem>>, vector<1x64x128xf32>,
    return
  }
  func.func @transform_0(%arg0: i32) -> (i32, i32, i32) {
    %c0_i32 = arith.constant 0 : i32
    %c0_i32_0 = arith.constant 0 : i32
    %c0_i32_1 = arith.constant 0 : i32
    return %arg0, %c0_i32, %c0_i32_0 : i32, i32, i32
  }
  func.func @transform_1(%arg0: i32) -> (i32, i32) {
    %c0_i32 = arith.constant 0 : i32
    %c0_i32_0 = arith.constant 0 : i32
    %c0_i32_1 = arith.constant 0 : i32
    return %c0_i32, %c0_i32_0 : i32, i32
  }
  func.func @transform_2(%arg0: i32) -> (i32, i32) {
    %c0_i32 = arith.constant 0 : i32
    %c0_i32_0 = arith.constant 0 : i32
    %c0_i32_1 = arith.constant 0 : i32
    return %c0_i32, %c0_i32_0 : i32, i32
  }
  func.func @transform_3(%arg0: i32) -> (i32, i32) {
    %c0_i32 = arith.constant 0 : i32
    %c0_i32_0 = arith.constant 0 : i32
    %c0_i32_1 = arith.constant 0 : i32
    return %c0_i32, %c0_i32_0 : i32, i32
  }
  func.func @transform_4(%arg0: i32) -> (i32, i32) {
    %c0_i32 = arith.constant 0 : i32
    %c0_i32_0 = arith.constant 0 : i32
    %c0_i32_1 = arith.constant 0 : i32
    return %c0_i32, %c0_i32_0 : i32, i32
  }
  func.func @transform_5(%arg0: i32) -> (i32, i32) {
    %c0_i32 = arith.constant 0 : i32
    %c0_i32_0 = arith.constant 0 : i32
    %c0_i32_1 = arith.constant 0 : i32
    return %c0_i32, %c0_i32_0 : i32, i32
  }
  func.func @transform_6(%arg0: i32) -> (i32, i32) {
    %c0_i32 = arith.constant 0 : i32
    %c0_i32_0 = arith.constant 0 : i32
    %c0_i32_1 = arith.constant 0 : i32
    return %c0_i32, %c0_i32_0 : i32, i32
  }
  func.func @transform_7(%arg0: i32) -> (i32, i32) {
    %c0_i32 = arith.constant 0 : i32
    %c0_i32_0 = arith.constant 0 : i32
    %c0_i32_1 = arith.constant 0 : i32
    return %c0_i32, %c0_i32_0 : i32, i32
  }
  func.func @transform_8(%arg0: i32) -> (i32, i32) {
    %c0_i32 = arith.constant 0 : i32
    %c0_i32_0 = arith.constant 0 : i32
    %c0_i32_1 = arith.constant 0 : i32
    return %c0_i32, %c0_i32_0 : i32, i32
  }
  func.func @transform_9(%arg0: i32) -> (i32, i32) {
    %c0_i32 = arith.constant 0 : i32
    %c0_i32_0 = arith.constant 0 : i32
    %c0_i32_1 = arith.constant 0 : i32
    return %c0_i32, %c0_i32_0 : i32, i32
  }
  func.func @transform_10(%arg0: i32) -> (i32, i32) {
    %c0_i32 = arith.constant 0 : i32
    %c0_i32_0 = arith.constant 0 : i32
    %c0_i32_1 = arith.constant 0 : i32
    return %c0_i32, %c0_i32_0 : i32, i32
  }
  func.func @transform_11(%arg0: i32) -> (i32, i32) {
    %c0_i32 = arith.constant 0 : i32
    %c0_i32_0 = arith.constant 0 : i32
    %c0_i32_1 = arith.constant 0 : i32
    return %c0_i32, %c0_i32_0 : i32, i32
  }
  func.func @transform_12(%arg0: i32) -> (i32, i32) {
    %c0_i32 = arith.constant 0 : i32
    %c0_i32_0 = arith.constant 0 : i32
    %c0_i32_1 = arith.constant 0 : i32
    return %c0_i32, %c0_i32_0 : i32, i32
  }
  func.func @transform_13(%arg0: i32) -> (i32, i32) {
    %c0_i32 = arith.constant 0 : i32
    %c0_i32_0 = arith.constant 0 : i32
    %c0_i32_1 = arith.constant 0 : i32
    return %c0_i32, %c0_i32_0 : i32, i32
  }
  func.func @transform_14(%arg0: i32) -> (i32, i32) {
    %c0_i32 = arith.constant 0 : i32
    %c0_i32_0 = arith.constant 0 : i32
    %c0_i32_1 = arith.constant 0 : i32
    return %c0_i32, %c0_i32_0 : i32, i32
  }
  func.func @transform_15(%arg0: i32) -> (i32, i32, i32) {
    %c0_i32 = arith.constant 0 : i32
    %c0_i32_0 = arith.constant 0 : i32
    %c0_i32_1 = arith.constant 0 : i32
    return %arg0, %c0_i32, %c0_i32_0 : i32, i32, i32
  }
  func.func @transform_16(%arg0: i32) -> (i32, i32, i32) {
    %c0_i32 = arith.constant 0 : i32
    %c0_i32_0 = arith.constant 0 : i32
    %c0_i32_1 = arith.constant 0 : i32
    return %arg0, %c0_i32, %c0_i32_0 : i32, i32, i32
  }
  func.func @transform_17(%arg0: i32) -> (i32, i32, i32) {
    %c0_i32 = arith.constant 0 : i32
    %c0_i32_0 = arith.constant 0 : i32
    %c0_i32_1 = arith.constant 0 : i32
    return %arg0, %c0_i32, %c0_i32_0 : i32, i32, i32
  }
  func.func @transform_18(%arg0: i32) -> (i32, i32, i32) {
    %c0_i32 = arith.constant 0 : i32
    %c0_i32_0 = arith.constant 0 : i32
    %c0_i32_1 = arith.constant 0 : i32
    return %arg0, %c0_i32, %c0_i32_0 : i32, i32, i32
  }
}

</mosaic_0001>

<bundles_post_ra>
// kernel: tpu_custom_call.1
= control target key start
LH: loop header
LB: loop body
LE: loop exit
PB: predicated region body
PF: predicated region fallthrough
CT: control target
= control target key end

     0   :  { %s2782_s0 = inlined_call_operand.vmem [shape: f32[2,4,128], index: 0, kind: input, shape index: {}]   ;;  %s2783_s1 = inlined_call_operand.vmem [shape: f32[32,4], index: 1, kind: input, shape index: {}]   ;;  %s2784_s2 = inlined_call_operand.vmem [shape: f32[32,1], index: 2, kind: input, shape index: {}]   ;;  %s2785_s3 = inlined_call_operand.vmem [shape: f32[64,32], index: 3, kind: input, shape index: {}]   ;;  %s2786_s4 = inlined_call_operand.vmem [shape: f32[64,1], index: 4, kind: input, shape index: {}]   ;;  %s2787_s5 = inlined_call_operand.vmem [shape: f32[64,32], index: 5, kind: input, shape index: {}]   ;;  %s2788_s6 = inlined_call_operand.vmem [shape: f32[1,32], index: 6, kind: input, shape index: {}]   ;;  %s2789_s7 = inlined_call_operand.vmem [shape: f32[32,16], index: 7, kind: input, shape index: {}]   ;;  %s2790_s8 = inlined_call_operand.vmem [shape: f32[1,16], index: 8, kind: input, shape index: {}]   ;;  %s2791_s9 = inlined_call_operand.vmem [shape: f32[4,16], index: 9, kind: input, shape index: {}]   ;;  %s2792_s10 = inlined_call_operand.vmem [shape: f32[16,4], index: 10, kind: input, shape index: {}]   ;;  %s2793_s11 = inlined_call_operand.vmem [shape: f32[32,4], index: 11, kind: input, shape index: {}]   ;;  %s2794_s12 = inlined_call_operand.vmem [shape: f32[32,1], index: 12, kind: input, shape index: {}]   ;;  %s2795_s13 = inlined_call_operand.vmem [shape: f32[64,32], index: 13, kind: input, shape index: {}]   ;;  %s2796_s14 = inlined_call_operand.vmem [shape: f32[64,1], index: 14, kind: input, shape index: {}]   ;;  %s2797_s15 = inlined_call_operand.hbm [shape: f32[2,4,4], index: 15, kind: output, shape index: {0}]   ;;  %s2798_s16 = inlined_call_operand.hbm [shape: f32[2,4,128], index: 16, kind: output, shape index: {1}]   ;;  %s2799_s17 = inlined_call_operand.hbm [shape: f32[2,32,128], index: 17, kind: output, shape index: {2}]   ;;  %s2800_s18 = inlined_call_operand.hbm [shape: f32[2,64,128], index: 18, kind: output, shape index: {3}]  }
   0x1   :  { %2813 = sst [smem:[#allocation18_spill]] %s2782_s0 }
   0x2   :  { %2814 = sst [smem:[#allocation19_spill]] %s2783_s1 }
   0x3   :  { %2815 = sst [smem:[#allocation20_spill]] %s2784_s2 }
   0x4   :  { %2816 = sst [smem:[#allocation21_spill]] %s2785_s3 }
   0x5   :  { %2817 = sst [smem:[#allocation22_spill]] %s2786_s4 }
   0x6   :  { %2818 = sst [smem:[#allocation23_spill]] %s2787_s5 }
   0x7   :  { %2819 = sst [smem:[#allocation24_spill]] %s2788_s6 }
   0x8   :  { %2820 = sst [smem:[#allocation25_spill]] %s2799_s17 }
   0x9   :  { %2821 = sst [smem:[#allocation26_spill]] %s2800_s18 }
   0xa   :  { %24 = vsyncpa [#allocation3], 0 }
   0xb   :  { %26 = vsyncpa [#allocation3 + $0x1], 0 }
   0xc   :  { %27 = vsyncpa [#allocation5], 0 }
   0xd   :  { %29 = vsyncpa [#allocation5 + $0x1], 0 }
   0xe   :  { %30 = vsyncpa [#allocation8], 0 }
   0xf   :  { %32 = vsyncpa [#allocation8 + $0x1], 0  ;;  %s2311_s27 = smov 0   ;;  %s2313_s28 = smov 0  }
  0x10   :  { %s2315_s29 = smov 0   ;;  %s2317_s30 = smov 0  }
  0x11 LB: > { %2822 = sst [smem:[#allocation12_spill]] %s2192_s27  ;;  %s2332_s0 = sadd.s32 4294967295, %s2204_s30   ;;  %s2204_s30 = sphi %s2317_s30, %s2843_s30   ;;  %s2200_s29 = sphi %s2315_s29, %s2845_s29   ;;  %s2196_s28 = sphi %s2313_s28, %s2847_s28   ;;  %s2192_s27 = sphi %s2311_s27, %s2846_s27  }
  0x12   : > { %2823 = sst [smem:[#allocation13_spill]] %s2200_s29  ;;  %s2803_s19 = sadd.s32 4294967294, %s2204_s30  }
  0x13   : > { %2824 = sst [smem:[#allocation14_spill]] %s2204_s30  ;;  %s2336_s1 = sadd.s32 1, %s2204_s30  }
  0x14   : > { %2825 = sst [smem:[#allocation15_spill]] %s2336_s1  ;;  %s365_s20 = sadd.s32 1, %s2200_s29 }
  0x15   : > { %s362_s21 = ssub.s32 %s2204_s30, %s2336_s1  ;;  %p375_p0 = scmp.ne.s32.totalorder %s2200_s29, %s2196_s28 }
  0x16   : > { %p363_p1 = scmp.eq.s32.totalorder %s362_s21, 0  ;;  %p376_p2 = scmp.eq.s32.totalorder %s2332_s0, 1 }
  0x17   : > { %p381_p3 = scmp.ne.s32.totalorder %s2196_s28, %s2192_s27  ;;  %p382_p4 = scmp.eq.s32.totalorder %s2803_s19, 1 }
  0x18   : > { %s2349_s22 = scalar_select %p363_p1, %s2200_s29, %s365_s20  }
  0x19   : > { %p2351_p5 = por %p376_p2, %p375_p0  ;;  %p2355_p6 = por %p382_p4, %p381_p3 }
  0x1a   : > { %2826 = sst [smem:[#allocation16_spill]] %s2349_s22  ;;  %p1786_p7 = scmp.ge.s32.totalorder %s2204_s30, 1 }
  0x1b   : > { %s2828_s23 = scalar_select %p2355_p6, 1, 0 }
  0x1c   : > { %p527_p8 = scmp.lt.s32.totalorder %s2204_s30, 3 }
  0x1d   : > { %2829 = sst [smem:[#allocation17_spill]] %s2828_s23 }
  0x1e   : > { %p528_p9 = pnand %p1786_p7, %p527_p8 }
  0x1f   : > { %p595_p10 = scmp.lt.s32.totalorder (!%p528_p9), %s2332_s0, 1  ;;  %s2830_s26 = sld [smem:[#allocation19_spill]] (!%p528_p9)  ;;  %vm628_vm0 = vcmask (!%p528_p9), 31744   ;;  %v2206_v3 = vmov (!%p528_p9), 0   ;;  %vm641_vm1 = vcmask (!%p528_p9), 1043456   ;;  %vm790_vm2 = vcmask (!%p528_p9), 261120  }
  0x20   : > { %531 = sbr.rel (%p528_p9) target bundleno = 1779 (0x6f3), region = 80  ;;  %s2831_s19 = sld [smem:[#allocation20_spill]] (!%p528_p9)  ;;  %2048 = vset.pattern.permute.xlu0 (!%p528_p9), %v2206_v3  ;;  %2049 = vset.pattern.permute.xlu1 (!%p528_p9), %v2206_v3  ;;  %vm2208_vm3 = vmmov (!%p528_p9), 0   ;;  %vm1070_vm4 = vcmask (!%p528_p9), 130048   ;;  %vm1144_vm5 = vcmask (!%p528_p9), 27648  }
  0x21   : > { %s2832_s20 = sld [smem:[#allocation18_spill]] (!%p528_p9)  ;;  %s2833_s4 = sld [smem:[#allocation22_spill]] (!%p528_p9) }
  0x22   : > { %s2834_s3 = sld [smem:[#allocation21_spill]] (!%p528_p9)  ;;  %s2835_s5 = sld [smem:[#allocation23_spill]] (!%p528_p9) }
  0x23   : > { %s2836_s6 = sld [smem:[#allocation24_spill]] (!%p528_p9)  ;;  %s2562_s29 = sand.u32 (!%p528_p9), 1, %s2196_s28  }
  0x24   : > { %s1787_s22 = sshll.u32 (!%p528_p9), %s2562_s29, 2  ;;  %s1789_s27 = sshll.u32 (!%p528_p9), %s2562_s29, 5 }
  0x25   : > { %v600_v0 = vld [vmem:[%s2830_s26] sm:$0xff] (!%p528_p9)  ;;  %v601_v7 = vld [vmem:[%s2830_s26 + $0x8] sm:$0xff] (!%p528_p9)  ;;  %v602_v8 = vld [vmem:[%s2830_s26 + $0x10] sm:$0xff] (!%p528_p9)  ;;  %s2580_s25 = scalar_lea.vmem (!%p528_p9), [#allocation4], %s1787_s22  ;;  %s2599_s30 = scalar_lea.vmem (!%p528_p9), [#allocation6], %s1789_s27 }
  0x26   : > { %1882 = vmatprep.mubr.msk.f32.mxu0 (!%p528_p9), %vm628_vm0, %v600_v0  ;;  %v604_v1 = vld [vmem:[%s2831_s19] sm:$0xff] (!%p528_p9)  ;;  %v606_v2 = vld [vmem:[%s2831_s19 + $0x10] sm:$0xff] (!%p528_p9)  ;;  %v605_v4 = vld [vmem:[%s2831_s19 + $0x8] sm:$0xff] (!%p528_p9)  ;;  %s1612_s17 = sshll.u32 (!%p528_p9), %s2599_s30, 4  ;;  %s1826_s18 = sshll.u32 (!%p528_p9), %s2332_s0, 6  ;;  %s2630_s17 = int_to_ptr.vmem [resolvable:$true] %s1612_s17 }
  0x27   : > { %s596_s1 = scalar_select %p595_p10, %s2332_s0, 1  ;;  %610 = vperm.xlu0 %2048, %v604_v1   ;;  %620 = vperm.xlu1 %2049, %v606_v2   ;;  %v607_v5 = vld [vmem:[%s2831_s19 + $0x18] sm:$0xff]  ;;  %v742_v9 = vld [vmem:[%s2833_s4] sm:$0xff]  ;;  %v743_v10 = vld [vmem:[%s2833_s4 + $0x8] sm:$0xff] }
  0x28   : > { %v603_v11 = vld [vmem:[%s2830_s26 + $0x18] sm:$0xff]  ;;  %v744_v12 = vld [vmem:[%s2833_s4 + $0x10] sm:$0xff]  ;;  %v746_v14 = vld [vmem:[%s2833_s4 + $0x20] sm:$0xff] }
  0x29   : > { %s1791_s23 = sshll.u32 %s596_s1, 2  ;;  %v745_v13 = vld [vmem:[%s2833_s4 + $0x18] sm:$0xff]  ;;  %v747_v15 = vld [vmem:[%s2833_s4 + $0x28] sm:$0xff]  ;;  %v748_v16 = vld [vmem:[%s2833_s4 + $0x30] sm:$0xff]  ;;  %s2565_s1 = scalar_lea.vmem [#allocation2], %s1787_s22 }
  0x2a   : > { %s598_s21 = scalar_lea.vmem %s2832_s20, %s1791_s23  ;;  %v749_v17 = vld [vmem:[%s2833_s4 + $0x38] sm:$0xff]  ;;  %v734_v18 = vld [vmem:[%s2834_s3] sm:$0xff]  ;;  %v735_v37 = vld [vmem:[%s2834_s3 + $0x8] sm:$0xff]  ;;  %s1562_s22 = sand.u32 1, %s2332_s0  }
  0x2b   : > { %v2382_v6 = vld [vmem:[%s598_s21] sm:$0xf]  ;;  %615 = vperm.xlu0 %2048, %v605_v4   ;;  %625 = vperm.xlu1 %2049, %v607_v5   ;;  %v736_v38 = vld [vmem:[%s2834_s3 + $0x10] sm:$0xff]  ;;  %v737_v39 = vld [vmem:[%s2834_s3 + $0x18] sm:$0xff]  ;;  %s2637_s23 = scalar_lea.hbm %s2798_s16, %s1826_s18  ;;  %s1599_s20 = sshll.u32 %s2580_s25, 4  ;;  %s2640_s20 = int_to_ptr.vmem [resolvable:$true] %s1599_s20 }
  0x2c   : > { %1880 = vmatprep.subr.msk.mxu0 %vm641_vm1, %v2382_v6  ;;  %1896 = vmatprep.mubr.msk.f32.mxu1 %vm790_vm2, %v734_v18  ;;  %v738_v40 = vld [vmem:[%s2834_s3 + $0x20] sm:$0xff]  ;;  %v739_v41 = vld [vmem:[%s2834_s3 + $0x28] sm:$0xff]  ;;  %v740_v42 = vld [vmem:[%s2834_s3 + $0x30] sm:$0xff]  ;;  %s2645_s21 = scalar_lea.hbm %s2797_s15, %s1826_s18  ;;  %s2050_s24 = scalar_lea.vmem %s2640_s20, 64 }
  0x2d   : > { %1881 = vmatpush3.msk.msra.mxu0 %vm641_vm1, %v2382_v6  ;;  %v741_v43 = vld [vmem:[%s2834_s3 + $0x38] sm:$0xff]  ;;  %v1364_v18 = vld [vmem:[%s2796_s14] sm:$0xff]  ;;  %p2051_p11 = scmp.ne.s32.totalorder %s2640_s20, %s2050_s24  ;;  %s2210_s3 = smov [#allocation4]  }
  0x2e   : > { %1883 = vmatmul.mubr.msk.f32.vlgmr.msra.gmra.mrb[0].mxu0 %vm628_vm0, %v601_v7  ;;  %s2054_s27 = sshll.u32 %s2210_s3, 4  ;;  %s2055_s27 = int_to_ptr.vmem [resolvable:$false] %s2054_s27 }
  0x2f   : > { %1885 = vmatprep.mubr.msk.f32.mxu0 %vm628_vm0, %v602_v8  ;;  %752 = vperm.xlu0 %2048, %v742_v9   ;;  %p2052_p12 = pnand %p2051_p11, %p2351_p5  ;;  %p2057_p0 = scmp.lt.s32.totalorder %s2640_s20, %s2055_s27 }
  0x30   : > { %757 = vperm.xlu1 %2049, %v743_v10  }
  0x31   : > { %p2053_p13 = pneg %p2052_p12 }
  0x32   : > { %1886 = vmatmul.mubr.msk.f32.gmra.mrb[2].mxu0 %vm628_vm0, %v603_v11 }
  0x33   : > { %762 = vperm.xlu0 %2048, %v744_v12  }
  0x34   : > { %767 = vperm.xlu1 %2049, %v745_v13   ;;  %v1224_v13 = vld [vmem:[%s2794_s12] sm:$0xff] }
  0x37   : > { %772 = vperm.xlu0 %2048, %v746_v14   ;;  %v1226_v14 = vld [vmem:[%s2794_s12 + $0x10] sm:$0xff] }
  0x38   : > { %777 = vperm.xlu1 %2049, %v747_v15   ;;  %v1227_v15 = vld [vmem:[%s2794_s12 + $0x18] sm:$0xff] }
  0x3b   : > { %782 = vperm.xlu0 %2048, %v748_v16   ;;  %v1225_v16 = vld [vmem:[%s2794_s12 + $0x8] sm:$0xff] }
  0x3c   : > { %787 = vperm.xlu1 %2049, %v749_v17   ;;  %v1365_v17 = vld [vmem:[%s2796_s14 + $0x8] sm:$0xff] }
  0xa6   : > { %v611_v19 = vpop.permute.xlu0 %610  ;;  %v621_v20 = vpop.permute.xlu1 %620 }
  0xaa   : > { %v616_v21 = vpop.permute.xlu0 %615  ;;  %v626_v27 = vpop.permute.xlu1 %625 }
  0xae   : > { %v753_v44 = vpop.permute.xlu0 %752 }
  0xaf   : > { %v758_v45 = vpop.permute.xlu1 %757 }
  0xb2   : > { %v763_v47 = vpop.permute.xlu0 %762 }
  0xb3   : > { %v768_v51 = vpop.permute.xlu1 %767 }
  0xb6   : > { %v773_v57 = vpop.permute.xlu0 %772 }
  0xb7   : > { %v778_v61 = vpop.permute.xlu1 %777 }
  0xba   : > { %v783_v4 = vpop.permute.xlu0 %782 }
  0xbb   : > { %v788_v8 = vpop.permute.xlu1 %787 }
 0x101   : > { %v1884_v22 = vpop.f32.mrb[0].mxu0 }
 0x102   : > { %v717_v23 = vadd.f32 %v1884_v22, %v616_v21  ;;  %v711_v24 = vpop.f32.mrb[1].mxu0  ;;  %v1367_v21 = vld [vmem:[%s2796_s14 + $0x18] sm:$0xff] }
 0x103   : > { %v712_v25 = vadd.f32 %v711_v24, %v611_v19  ;;  %v984_v19 = vld [vmem:[%s2789_s7] sm:$0xff]  ;;  %v2207_v24 = vmov 0.0|0.0  }
 0x104   : > { %v731_v26 = vmax.f32 %v717_v23, 0.0  ;;  %v1366_v23 = vld [vmem:[%s2796_s14 + $0x10] sm:$0xff]  ;;  %1967 = vmatprep.subr.bf16.mxu0 %v2207_v24 }
 0x105   : > { %v730_v28 = vmax.f32 %v712_v25, 0.0  ;;  %v1887_v29 = vpop.f32.mrb[2].mxu0  ;;  %v986_v25 = vld [vmem:[%s2789_s7 + $0x10] sm:$0xff] }
 0x106   : > { %v727_v30 = vadd.f32 %v1887_v29, %v626_v27  ;;  %v721_v31 = vpop.f32.mrb[3].mxu0  ;;  %v1369_v27 = vld [vmem:[%s2796_s14 + $0x28] sm:$0xff]  ;;  %v1368_v29 = vld [vmem:[%s2796_s14 + $0x20] sm:$0xff] }
 0x107   : > { %v722_v32 = vadd.f32 %v721_v31, %v621_v20  ;;  %v1959_v33 = vpack.c.bf16 %v731_v26, %v730_v28  ;;  %v985_v20 = vld [vmem:[%s2789_s7 + $0x8] sm:$0xff]  ;;  %v987_v26 = vld [vmem:[%s2789_s7 + $0x18] sm:$0xff]  ;;  %v2209_v31 = vmov 0.0  }
 0x108   : > { %v733_v34 = vmax.f32 %v727_v30, 0.0  ;;  %v1968_v22 = vpack.c.bf16 %v985_v20, %v984_v19  ;;  %v1971_v28 = vpack.c.bf16 %v987_v26, %v986_v25  ;;  %v1371_v30 = vld [vmem:[%s2796_s14 + $0x38] sm:$0xff]  ;;  %1916 = vmatprep.mubr.msk.f32.mxu0 %vm2208_vm3, %v2209_v31  ;;  %v1069_v19 = vld [vmem:[%s2792_s10 + $0x8] sm:$0xff] }
 0x109   : > { %v732_v35 = vmax.f32 %v722_v32, 0.0  ;;  %1960 = vmatprep.subr.bf16.mxu1 %v1959_v33  ;;  %v1370_v32 = vld [vmem:[%s2796_s14 + $0x30] sm:$0xff] }
 0x10a   : > { %1962 = vmatpush3.bf16.msra.mxu1 %v1959_v33  ;;  %1969 = vmatpush3.bf16.msra.mxu0 %v1968_v22  ;;  %v945_v33 = vld [vmem:[%s2835_s5 + $0x8] sm:$0xff] }
 0x10b   : > { %v1963_v36 = vpack.c.bf16 %v733_v34, %v732_v35  ;;  %1970 = vmatprep.subr.bf16.mxu0 %v2207_v24  ;;  %v944_v34 = vld [vmem:[%s2835_s5] sm:$0xff] }
 0x10d   : > { %1964 = vmatprep.subr.bf16.mxu1 %v1963_v36 }
 0x10e   : > { %1966 = vmatpush3.bf16.msra.mxu1 %v1963_v36  ;;  %1972 = vmatpush3.bf16.msra.mxu0 %v1971_v28  ;;  %v1062_v28 = vld [vmem:[%s2791_s9] sm:$0xf] }
 0x10f   : > { %1973 = vmatprep.subr.bf16.mxu0 %v2207_v24 }
 0x111   : > { %1897 = vmatmul.mubr.msk.f32.vlgmr.msra.gmra.mrb[0].mxu1 %vm790_vm2, %v735_v37 }
 0x112   : > { %1899 = vmatprep.mubr.msk.f32.mxu1 %vm790_vm2, %v736_v38 }
 0x115   : > { %1900 = vmatmul.mubr.msk.f32.gmra.mrb[2].mxu1 %vm790_vm2, %v737_v39  ;;  %v946_v39 = vld [vmem:[%s2835_s5 + $0x10] sm:$0xff] }
 0x116   : > { %1902 = vmatprep.mubr.msk.f32.mxu1 %vm790_vm2, %v738_v40 }
 0x119   : > { %1903 = vmatmul.mubr.msk.f32.gmra.mrb[4].mxu1 %vm790_vm2, %v739_v41 }
 0x11a   : > { %1905 = vmatprep.mubr.msk.f32.mxu1 %vm790_vm2, %v740_v42 }
 0x11d   : > { %1906 = vmatmul.mubr.msk.f32.gmra.mrb[6].mxu1 %vm790_vm2, %v741_v43 }
 0x1e4   : > { %v1898_v46 = vpop.f32.mrb[0].mxu1 }
 0x1e5   : > { %v887_v48 = vadd.f32 %v1898_v46, %v758_v45  ;;  %v881_v49 = vpop.f32.mrb[1].mxu1  ;;  %v947_v45 = vld [vmem:[%s2835_s5 + $0x18] sm:$0xff] }
 0x1e6   : > { %v882_v50 = vadd.f32 %v881_v49, %v753_v44  ;;  %v948_v44 = vld [vmem:[%s2835_s5 + $0x20] sm:$0xff] }
 0x1e7   : > { %v921_v52 = vmax.f32 %v887_v48, 0.0 }
 0x1e8   : > { %v920_v53 = vmax.f32 %v882_v50, 0.0  ;;  %v1901_v54 = vpop.f32.mrb[2].mxu1 }
 0x1e9   : > { %930 = vmax.xlane.f32.xlu1 %v921_v52  ;;  %v891_v55 = vpop.f32.mrb[3].mxu1  ;;  %v897_v58 = vadd.f32 %v1901_v54, %v768_v51  ;;  %v949_v54 = vld [vmem:[%s2835_s5 + $0x28] sm:$0xff] }
 0x1ea   : > { %v892_v56 = vadd.f32 %v891_v55, %v763_v47  ;;  %928 = vmax.xlane.f32.xlu0 %v920_v53  ;;  %v950_v53 = vld [vmem:[%s2835_s5 + $0x30] sm:$0xff] }
 0x1eb   : > { %v923_v0 = vmax.f32 %v897_v58, 0.0 }
 0x1ec   : > { %v922_v59 = vmax.f32 %v892_v56, 0.0  ;;  %v1904_v60 = vpop.f32.mrb[4].mxu1 }
 0x1ed   : > { %v901_v62 = vpop.f32.mrb[5].mxu1  ;;  %v907_v1 = vadd.f32 %v1904_v60, %v778_v61 }
 0x1ee   : > { %v902_v63 = vadd.f32 %v901_v62, %v773_v57  ;;  %932 = vmax.xlane.f32.xlu0 %v922_v59 }
 0x1ef   : > { %v925_v9 = vmax.f32 %v907_v1, 0.0 }
 0x1f0   : > { %v924_v2 = vmax.f32 %v902_v63, 0.0  ;;  %v1907_v3 = vpop.f32.mrb[6].mxu1  ;;  %v951_v63 = vld [vmem:[%s2835_s5 + $0x38] sm:$0xff] }
 0x1f1   : > { %v911_v5 = vpop.f32.mrb[7].mxu1  ;;  %v917_v10 = vadd.f32 %v1907_v3, %v788_v8 }
 0x1f2   : > { %v912_v7 = vadd.f32 %v911_v5, %v783_v4  ;;  %936 = vmax.xlane.f32.xlu1 %v924_v2  ;;  %934 = vmax.xlane.f32.xlu0 %v923_v0 }
 0x1f3   : > { %v927_v12 = vmax.f32 %v917_v10, 0.0 }
 0x1f4   : > { %v926_v11 = vmax.f32 %v912_v7, 0.0 }
 0x1f6   : > { %940 = vmax.xlane.f32.xlu1 %v926_v11  ;;  %938 = vmax.xlane.f32.xlu0 %v925_v9 }
 0x1fa   : > { %942 = vmax.xlane.f32.xlu0 %v927_v12 }
 0x207   : > { %1230 = vperm.xlu1 %2049, %v1224_v13  }
 0x20b   : > { %1240 = vperm.xlu1 %2049, %v1226_v14   ;;  %v981_v14 = vld [vmem:[%s2836_s6] sm:$0x1] }
 0x20f   : > { %1245 = vperm.xlu1 %2049, %v1227_v15  }
 0x210   : > { %1235 = vperm.xlu0 %2048, %v1225_v16  }
 0x213   : > { %1379 = vperm.xlu1 %2049, %v1365_v17  }
 0x214   : > { %1374 = vperm.xlu0 %2048, %v1364_v18   ;;  %v1068_v18 = vld [vmem:[%s2792_s10] sm:$0xff] }
 0x215   : > { %v1974_v20 = vpack.c.bf16 %v1069_v19, %v1068_v18 }
 0x217   : > { %1389 = vperm.xlu1 %2049, %v1367_v21   ;;  %v1063_v21 = vlaneseq }
 0x218   : > { %1384 = vperm.xlu0 %2048, %v1366_v23   ;;  %v988_v23 = vld [vmem:[%s2790_s8] sm:$0x1] }
 0x219   : > { %v1064_v22 = vshrl.u32 %v1063_v21, 7 }
 0x21b   : > { %1399 = vperm.xlu1 %2049, %v1369_v27   ;;  %v1065_v24 = vsub.s32 0, %v1064_v22 }
 0x21c   : > { %1394 = vperm.xlu0 %2048, %v1368_v29  }
 0x21f   : > { %1409 = vperm.xlu1 %2049, %v1371_v30  }
 0x220   : > { %1404 = vperm.xlu0 %2048, %v1370_v32  }
 0x276   : > { %v931_v35 = vpop.xlane.xlu1 %930 }
 0x277   : > { %v929_v36 = vpop.xlane.xlu0 %928  ;;  %v953_v37 = vmul.f32 %v945_v33, %v931_v35 }
 0x278   : > { %v952_v38 = vmul.f32 %v944_v34, %v929_v36  ;;  %v1221_v34 = vld [vmem:[%s2793_s11 + $0x8] sm:$0xff]  ;;  %v1222_v36 = vld [vmem:[%s2793_s11 + $0x10] sm:$0xff] }
 0x279   : > { %v961_v41 = vsel %vm790_vm2, %v953_v37, 0.0  ;;  %v1223_v37 = vld [vmem:[%s2793_s11 + $0x18] sm:$0xff] }
 0x27a   : > { %v960_v42 = vsel %vm790_vm2, %v952_v38, 0.0  ;;  %v1356_v38 = vld [vmem:[%s2795_s13] sm:$0xff] }
 0x27b   : > { %v933_v40 = vpop.xlane.xlu0 %932  ;;  %v962_v47 = vadd.f32 %v961_v41, %v960_v42 }
 0x27c   : > { %v954_v43 = vmul.f32 %v946_v39, %v933_v40  ;;  %v1358_v39 = vld [vmem:[%s2795_s13 + $0x10] sm:$0xff] }
 0x27d   : > { %1950 = vmatprep.mubr.msk.f32.mxu1 %vm790_vm2, %v1358_v39 }
 0x27e   : > { %v963_v46 = vsel %vm790_vm2, %v954_v43, 0.0 }
 0x27f   : > { %v937_v48 = vpop.xlane.xlu1 %936  ;;  %v935_v49 = vpop.xlane.xlu0 %934  ;;  %v964_v52 = vadd.f32 %v963_v46, %v962_v47 }
 0x280   : > { %v956_v50 = vmul.f32 %v948_v44, %v937_v48  ;;  %v955_v51 = vmul.f32 %v947_v45, %v935_v49 }
 0x282   : > { %v965_v55 = vsel %vm790_vm2, %v955_v51, 0.0  ;;  %v967_v59 = vsel %vm790_vm2, %v956_v50, 0.0 }
 0x283   : > { %v966_v56 = vadd.f32 %v965_v55, %v964_v52  ;;  %v941_v57 = vpop.xlane.xlu1 %940  ;;  %v939_v58 = vpop.xlane.xlu0 %938 }
 0x284   : > { %v958_v60 = vmul.f32 %v950_v53, %v941_v57  ;;  %v957_v61 = vmul.f32 %v949_v54, %v939_v58  ;;  %v1357_v58 = vld [vmem:[%s2795_s13 + $0x8] sm:$0xff] }
 0x285   : > { %v968_v62 = vadd.f32 %v967_v59, %v966_v56  ;;  %v1359_v59 = vld [vmem:[%s2795_s13 + $0x18] sm:$0xff] }
 0x286   : > { %v969_v0 = vsel %vm790_vm2, %v957_v61, 0.0  ;;  %v971_v3 = vsel %vm790_vm2, %v958_v60, 0.0  ;;  %v1360_v60 = vld [vmem:[%s2795_s13 + $0x20] sm:$0xff]  ;;  %v1361_v61 = vld [vmem:[%s2795_s13 + $0x28] sm:$0xff] }
 0x287   : > { %v970_v1 = vadd.f32 %v969_v0, %v968_v62  ;;  %v943_v2 = vpop.xlane.xlu0 %942  ;;  %v1231_v40 = vpop.permute.xlu1 %1230  ;;  %v1362_v62 = vld [vmem:[%s2795_s13 + $0x30] sm:$0xff] }
 0x288   : > { %v959_v4 = vmul.f32 %v951_v63, %v943_v2  ;;  %v1363_v63 = vld [vmem:[%s2795_s13 + $0x38] sm:$0xff] }
 0x289   : > { %v972_v5 = vadd.f32 %v971_v3, %v970_v1 }
 0x28a   : > { %v973_v7 = vsel %vm790_vm2, %v959_v4, 0.0 }
 0x28b   : > { %v974_v8 = vadd.f32 %v973_v7, %v972_v5  ;;  %v1241_v41 = vpop.permute.xlu1 %1240 }
 0x28d   : > { %v975_v9 = vrot.slane %v974_v8, 4 }
 0x28f   : > { %v976_v10 = vadd.f32 %v975_v9, %v974_v8  ;;  %v1236_v42 = vpop.permute.xlu0 %1235  ;;  %v1246_v48 = vpop.permute.xlu1 %1245 }
 0x291   : > { %v977_v11 = vrot.slane %v976_v10, 2 }
 0x293   : > { %v978_v12 = vadd.f32 %v977_v11, %v976_v10 }
 0x295   : > { %v979_v13 = vrot.slane %v978_v12, 1 }
 0x297   : > { %v980_v15 = vadd.f32 %v979_v13, %v978_v12 }
 0x299   : > { %v982_v16 = vadd.f32 %v981_v14, %v980_v15 }
 0x29b   : > { %v983_v17 = vmax.f32 %v982_v16, 0.0 }
 0x29d   : > { %1917 = vmatmul.mubr.msk.f32.vlgmr.msra.gmra.mrb[4].mxu0 %vm790_vm2, %v983_v17 }
 0x29e   : > { %1923 = vmatprep.mubr.msk.f32.mxu0 %vm2208_vm3, %v2209_v31  ;;  %1975 = vmatpush3.bf16.msra.mxu0 %v1974_v20 }
 0x29f   : > { %1926 = vmatprep.subr.mxu0 %v2209_v31 }
 0x370   : > { %v1058_v25 = vpop.f32.mrb[4].mxu0 }
 0x371   : > { %v1059_v26 = vadd.f32 %v1058_v25, %v988_v23  ;;  %v1918_v27 = vpop.f32.mrb[5].mxu0 }
 0x373   : > { %v1066_v29 = vrot.slane %v1059_v26, %v1065_v24 }
 0x375   : > { %v1067_v30 = vmul.f32 %v1066_v29, %v1062_v28 }
 0x377   : > { %1924 = vmatmul.mubr.msk.f32.vlgmr.msra.gmra.mrb[6].mxu0 %vm1070_vm4, %v1067_v30 }
 0x378   : > { %1927 = vmatpush3.msk.msra.mxu0 %vm641_vm1, %v2382_v6  ;;  %1928 = vmatprep.mubr.msk.f32.mxu0 %vm2208_vm3, %v2209_v31  ;;  %v1220_v6 = vld [vmem:[%s2793_s11] sm:$0xff] }
 0x44a   : > { %v1140_v32 = vpop.f32.mrb[6].mxu0 }
 0x44b   : > { %1145 = vst.msk [vmem:[%s2565_s1] sm:$0xf] %vm1144_vm5, %v1140_v32  ;;  %v1925_v33 = vpop.f32.mrb[7].mxu0  ;;  %1929 = vmatmul.mubr.msk.f32.vlgmr.msra.gmra.mrb[8].mxu0 %vm628_vm0, %v1140_v32 }
 0x44c   : > { %1933 = vmatprep.mubr.msk.f32.mxu0 %vm628_vm0, %v1220_v6 }
 0x51e   : > { %v1215_v31 = vpop.f32.mrb[8].mxu0 }
 0x51f   : > { %v1930_v35 = vpop.f32.mrb[9].mxu0  ;;  %1931 = vmatprep.subr.msk.mxu0 %vm641_vm1, %v1215_v31  ;;  %1219 = vst [vmem:[%s2580_s25] sm:$0xf] %v1215_v31  ;;  %s2056_s25 = scalar_lea.vmem %s2055_s27, 128 }
 0x520   : > { %1932 = vmatpush3.msk.msra.mxu0 %vm641_vm1, %v1215_v31  ;;  %p2058_p1 = scmp.lt.s32.totalorder %s2056_s25, %s2050_s24 }
 0x521   : > { %1934 = vmatmul.mubr.msk.f32.vlgmr.msra.gmra.mrb[10].mxu0 %vm628_vm0, %v1221_v34 }
 0x522   : > { %1936 = vmatprep.mubr.msk.f32.mxu0 %vm628_vm0, %v1222_v36  ;;  %p2059_p2 = por %p2058_p1, %p2057_p0 }
 0x524   : > { %p2060_p3 = pnand %p2059_p2, %p2053_p13 }
 0x525   : > { %1937 = vmatmul.mubr.msk.f32.gmra.mrb[12].mxu0 %vm628_vm0, %v1223_v37 }
 0x526   : > { %1947 = vmatprep.mubr.msk.f32.mxu0 %vm790_vm2, %v1356_v38 }
 0x5f4   : > { %v1935_v43 = vpop.f32.mrb[10].mxu0 }
 0x5f5   : > { %v1335_v44 = vadd.f32 %v1935_v43, %v1236_v42  ;;  %v1329_v45 = vpop.f32.mrb[11].mxu0 }
 0x5f6   : > { %v1330_v46 = vadd.f32 %v1329_v45, %v1231_v40 }
 0x5f7   : > { %v1349_v47 = vmax.f32 %v1335_v44, 0.0 }
 0x5f8   : > { %v1348_v49 = vmax.f32 %v1330_v46, 0.0  ;;  %v1938_v50 = vpop.f32.mrb[12].mxu0 }
 0x5f9   : > { %1353 = vst [vmem:[%s2599_s30 + $0x8] sm:$0xff] %v1349_v47  ;;  %v1345_v51 = vadd.f32 %v1938_v50, %v1246_v48  ;;  %v1339_v52 = vpop.f32.mrb[13].mxu0 }
 0x5fa   : > { %1352 = vst [vmem:[%s2599_s30] sm:$0xff] %v1348_v49  ;;  %v1976_v53 = vpack.c.bf16 %v1349_v47, %v1348_v49  ;;  %v1340_v54 = vadd.f32 %v1339_v52, %v1241_v41 }
 0x5fb   : > { %v1351_v55 = vmax.f32 %v1345_v51, 0.0 }
 0x5fc   : > { %v1350_v56 = vmax.f32 %v1340_v54, 0.0  ;;  %1977 = vmatprep.subr.bf16.mxu0 %v1976_v53  ;;  %1984 = vmatprep.subr.bf16.mxu1 %v1976_v53 }
 0x5fd   : > { %1355 = vst [vmem:[%s2599_s30 + $0x18] sm:$0xff] %v1351_v55  ;;  %1979 = vmatpush3.bf16.msra.mxu0 %v1976_v53  ;;  %1986 = vmatpush3.bf16.msra.mxu1 %v1976_v53 }
 0x5fe   : > { %1354 = vst [vmem:[%s2599_s30 + $0x10] sm:$0xff] %v1350_v56  ;;  %v1980_v57 = vpack.c.bf16 %v1351_v55, %v1350_v56  ;;  %s2647_s30 = scalar_lea.sflag [#allocation5], %s1562_s22 }
 0x600   : > { %1981 = vmatprep.subr.bf16.mxu0 %v1980_v57  ;;  %1985 = vmatprep.subr.bf16.mxu1 %v1980_v57 }
 0x601   : > { %1983 = vmatpush3.bf16.msra.mxu0 %v1980_v57  ;;  %1987 = vmatpush3.bf16.msra.mxu1 %v1980_v57 }
 0x604   : > { %1948 = vmatmul.mubr.msk.f32.vlgmr.msra.gmra.mrb[14].mxu0 %vm790_vm2, %v1357_v58  ;;  %1951 = vmatmul.mubr.msk.f32.vlgmr.msra.gmra.mrb[8].mxu1 %vm790_vm2, %v1359_v59 }
 0x605   : > { %1953 = vmatprep.mubr.msk.f32.mxu1 %vm790_vm2, %v1360_v60 }
 0x608   : > { %1954 = vmatmul.mubr.msk.f32.gmra.mrb[10].mxu1 %vm790_vm2, %v1361_v61 }
 0x609   : > { %1956 = vmatprep.mubr.msk.f32.mxu1 %vm790_vm2, %v1362_v62 }
 0x60c   : > { %1957 = vmatmul.mubr.msk.f32.gmra.mrb[12].mxu1 %vm790_vm2, %v1363_v63 }
 0x60d   : > { %2063 = shalt.err (!%p2060_p3)
}
 0x60e   : > { %s2064_s4 = scalar_lea.hbm %s2637_s23, 64  ;;  %s2068_s18 = scalar_lea.hbm %s2798_s16, 128 }
 0x60f   : > { %p2065_p4 = scmp.ne.s32.totalorder %s2637_s23, %s2064_s4  ;;  %p2069_p9 = scmp.lt.u32.totalorder %s2637_s23, %s2798_s16 }
 0x610   : > { %p2070_p10 = scmp.lt.u32.totalorder %s2068_s18, %s2064_s4  ;;  %p2072_p12 = scmp.lt.u32.totalorder %s2064_s4, %s2637_s23 }
 0x611   : > { %p2066_p7 = pnand %p2065_p4, %p2351_p5 }
 0x612   : > { %p2071_p11 = por %p2070_p10, %p2069_p9 }
 0x613   : > { %p2067_p8 = pneg %p2066_p7 }
 0x614   : > { %p2073_p13 = por %p2072_p12, %p2071_p11 }
 0x616   : > { %p2074_p0 = pnand %p2073_p13, %p2067_p8 }
 0x618   : > { %2077 = shalt.err (!%p2074_p0)
}
 0x619   : > { %1989 = dma.vmem_to_hbm [thread:$0]  (%p2351_p5), %s2640_s20, 64, %s2637_s23, %s2647_s30  }
 0x61a   : > { %s1586_s24 = sshll.u32 %s2565_s1, 4  ;;  %s1834_s25 = sshll.u32 %s2332_s0, 9  ;;  %s2673_s24 = int_to_ptr.vmem [resolvable:$true] %s1586_s24 }
 0x61b   : > { %s2837_s4 = sld [smem:[#allocation25_spill]]  ;;  %s1558_s3 = scalar_lea.sflag [#allocation3], %s2562_s29 }
 0x61c   : > { %s2078_s27 = scalar_lea.vmem %s2673_s24, 64  ;;  %s2211_s6 = smov [#allocation2]  }
 0x61d   : > { %p2079_p1 = scmp.ne.s32.totalorder %s2673_s24, %s2078_s27  ;;  %s2082_s23 = sshll.u32 %s2211_s6, 4  ;;  %s2083_s23 = int_to_ptr.vmem [resolvable:$false] %s2082_s23 }
 0x61e   : > { %s2084_s1 = scalar_lea.vmem %s2083_s23, 128  ;;  %p2085_p4 = scmp.lt.s32.totalorder %s2673_s24, %s2083_s23 }
 0x61f   : > { %p2080_p2 = pnand %p2079_p1, %p2351_p5  ;;  %p2086_p7 = scmp.lt.s32.totalorder %s2084_s1, %s2078_s27 }
 0x621   : > { %s2678_s18 = scalar_lea.hbm %s2837_s4, %s1834_s25  ;;  %p2081_p3 = pneg %p2080_p2 }
 0x622   : > { %p2087_p8 = por %p2086_p7, %p2085_p4 }
 0x624   : > { %p2088_p9 = pnand %p2087_p8, %p2081_p3 }
 0x626   : > { %2091 = shalt.err (!%p2088_p9)
}
 0x627   : > { %s2092_s20 = scalar_lea.hbm %s2645_s21, 64  ;;  %s2096_s6 = scalar_lea.hbm %s2797_s15, 128 }
 0x628   : > { %p2093_p10 = scmp.ne.s32.totalorder %s2645_s21, %s2092_s20  ;;  %p2097_p13 = scmp.lt.u32.totalorder %s2645_s21, %s2797_s15 }
 0x629   : > { %p2098_p0 = scmp.lt.u32.totalorder %s2096_s6, %s2092_s20  ;;  %p2100_p2 = scmp.lt.u32.totalorder %s2092_s20, %s2645_s21 }
 0x62a   : > { %p2094_p11 = pnand %p2093_p10, %p2351_p5 }
 0x62b   : > { %p2099_p1 = por %p2098_p0, %p2097_p13 }
 0x62c   : > { %p2095_p12 = pneg %p2094_p11 }
 0x62d   : > { %p2101_p3 = por %p2100_p2, %p2099_p1 }
 0x62f   : > { %p2102_p4 = pnand %p2101_p3, %p2095_p12 }
 0x631   : > { %2105 = shalt.err (!%p2102_p4)
}
 0x632   : > { %1988 = dma.vmem_to_hbm [thread:$0]  (%p2351_p5), %s2673_s24, 64, %s2645_s21, %s1558_s3  }
 0x633   : > { %s2106_s27 = scalar_lea.vmem %s2630_s17, 512  ;;  %s2212_s1 = smov [#allocation6]  }
 0x634   : > { %p2107_p7 = scmp.ne.s32.totalorder %s2630_s17, %s2106_s27  ;;  %s2110_s25 = sshll.u32 %s2212_s1, 4  ;;  %s2111_s25 = int_to_ptr.vmem [resolvable:$false] %s2110_s25 }
 0x635   : > { %s2112_s20 = scalar_lea.vmem %s2111_s25, 1024  ;;  %p2113_p10 = scmp.lt.s32.totalorder %s2630_s17, %s2111_s25 }
 0x636   : > { %p2108_p8 = pnand %p2107_p7, %p2351_p5  ;;  %p2114_p11 = scmp.lt.s32.totalorder %s2112_s20, %s2106_s27 }
 0x638   : > { %p2109_p9 = pneg %p2108_p8  ;;  %p2115_p12 = por %p2114_p11, %p2113_p10 }
 0x63a   : > { %p2116_p13 = pnand %p2115_p12, %p2109_p9 }
 0x63c   : > { %2119 = shalt.err (!%p2116_p13)
}
 0x63d   : > { %s2120_s21 = scalar_lea.hbm %s2678_s18, 512  ;;  %s2124_s5 = scalar_lea.hbm %s2837_s4, 1024 }
 0x63e   : > { %p2121_p0 = scmp.ne.s32.totalorder %s2678_s18, %s2120_s21  ;;  %p2125_p3 = scmp.lt.u32.totalorder %s2678_s18, %s2837_s4 }
 0x63f   : > { %p2126_p4 = scmp.lt.u32.totalorder %s2124_s5, %s2120_s21  ;;  %p2128_p8 = scmp.lt.u32.totalorder %s2120_s21, %s2678_s18 }
 0x640   : > { %p2122_p1 = pnand %p2121_p0, %p2351_p5 }
 0x641   : > { %p2127_p7 = por %p2126_p4, %p2125_p3 }
 0x642   : > { %p2123_p2 = pneg %p2122_p1 }
 0x643   : > { %p2129_p9 = por %p2128_p8, %p2127_p7 }
 0x645   : > { %p2130_p10 = pnand %p2129_p9, %p2123_p2 }
 0x647   : > { %2133 = shalt.err (!%p2130_p10)
}
 0x648   : > { %s2213_s23 = smov 128   ;;  %s2214_s27 = smov 8   ;;  %v1380_v0 = vpop.permute.xlu1 %1379  ;;  %v1375_v1 = vpop.permute.xlu0 %1374 }
 0x649   : > { %1990 = dma.vmem_to_hbm [thread:$0]  (%p2351_p5), %s2630_s17, 512, %s2678_s18, %s2647_s30, %s2213_s23, %s2213_s23, %s2214_s27  }
 0x64a   : > { %s1790_s1 = sshll.u32 %s2562_s29, 6  ;;  %s1835_s18 = sshll.u32 %s2332_s0, 10 }
 0x64b   : > { %s594_s17 = scalar_lea.vmem [#allocation7], %s1790_s1  ;;  %s2838_s21 = sld [smem:[#allocation26_spill]] }
 0x64c   : > { %v1390_v2 = vpop.permute.xlu1 %1389  ;;  %v1385_v3 = vpop.permute.xlu0 %1384  ;;  %s1628_s30 = sshll.u32 %s594_s17, 4  ;;  %s1573_s3 = scalar_lea.sflag [#allocation8], %s2562_s29  ;;  %s2729_s30 = int_to_ptr.vmem [resolvable:$true] %s1628_s30 }
 0x64d   : > { %s2134_s5 = scalar_lea.vmem %s2729_s30, 1024  ;;  %s2215_s0 = smov [#allocation7]  }
 0x64e   : > { %p2135_p11 = scmp.ne.s32.totalorder %s2729_s30, %s2134_s5  ;;  %s2138_s6 = sshll.u32 %s2215_s0, 4  ;;  %s2139_s6 = int_to_ptr.vmem [resolvable:$false] %s2138_s6 }
 0x64f   : > { %s2140_s22 = scalar_lea.vmem %s2139_s6, 2048  ;;  %p2141_p0 = scmp.lt.s32.totalorder %s2729_s30, %s2139_s6 }
 0x650   : > { %v1400_v11 = vpop.permute.xlu1 %1399  ;;  %v1395_v14 = vpop.permute.xlu0 %1394  ;;  %p2136_p12 = pnand %p2135_p11, %p2351_p5  ;;  %p2142_p1 = scmp.lt.s32.totalorder %s2140_s22, %s2134_s5 }
 0x651   : > { %s2734_s24 = scalar_lea.hbm %s2838_s21, %s1835_s18 }
 0x652   : > { %p2137_p13 = pneg %p2136_p12  ;;  %p2143_p2 = por %p2142_p1, %p2141_p0 }
 0x654   : > { %v1410_v24 = vpop.permute.xlu1 %1409  ;;  %v1405_v27 = vpop.permute.xlu0 %1404  ;;  %p2144_p3 = pnand %p2143_p2, %p2137_p13 }
 0x6d7   : > { %v1949_v4 = vpop.f32.mrb[14].mxu0  ;;  %v1952_v5 = vpop.f32.mrb[8].mxu1 }
 0x6d8   : > { %v1508_v7 = vadd.f32 %v1949_v4, %v1380_v0  ;;  %v1518_v8 = vadd.f32 %v1952_v5, %v1390_v2  ;;  %v1502_v9 = vpop.f32.mrb[15].mxu0  ;;  %v1512_v10 = vpop.f32.mrb[9].mxu1 }
 0x6d9   : > { %v1503_v12 = vadd.f32 %v1502_v9, %v1375_v1  ;;  %v1513_v13 = vadd.f32 %v1512_v10, %v1385_v3 }
 0x6da   : > { %v1542_v15 = vmax.f32 %v1508_v7, 0.0  ;;  %v1544_v16 = vmax.f32 %v1518_v8, 0.0 }
 0x6db   : > { %v1541_v17 = vmax.f32 %v1503_v12, 0.0  ;;  %v1543_v18 = vmax.f32 %v1513_v13, 0.0  ;;  %v1955_v19 = vpop.f32.mrb[10].mxu1 }
 0x6dc   : > { %1550 = vst [vmem:[%s594_s17 + $0x8] sm:$0xff] %v1542_v15  ;;  %1552 = vst [vmem:[%s594_s17 + $0x18] sm:$0xff] %v1544_v16  ;;  %v1528_v20 = vadd.f32 %v1955_v19, %v1400_v11  ;;  %v1522_v21 = vpop.f32.mrb[11].mxu1 }
 0x6dd   : > { %1549 = vst [vmem:[%s594_s17] sm:$0xff] %v1541_v17  ;;  %1551 = vst [vmem:[%s594_s17 + $0x10] sm:$0xff] %v1543_v18  ;;  %v1523_v22 = vadd.f32 %v1522_v21, %v1395_v14 }
 0x6de   : > { %v1546_v23 = vmax.f32 %v1528_v20, 0.0 }
 0x6df   : > { %v1545_v25 = vmax.f32 %v1523_v22, 0.0  ;;  %v1958_v26 = vpop.f32.mrb[12].mxu1 }
 0x6e0   : > { %1554 = vst [vmem:[%s594_s17 + $0x28] sm:$0xff] %v1546_v23  ;;  %v1538_v28 = vadd.f32 %v1958_v26, %v1410_v24  ;;  %v1532_v29 = vpop.f32.mrb[13].mxu1 }
 0x6e1   : > { %1553 = vst [vmem:[%s594_s17 + $0x20] sm:$0xff] %v1545_v25  ;;  %v1533_v30 = vadd.f32 %v1532_v29, %v1405_v27 }
 0x6e2   : > { %v1548_v32 = vmax.f32 %v1538_v28, 0.0 }
 0x6e3   : > { %v1547_v33 = vmax.f32 %v1533_v30, 0.0 }
 0x6e4   : > { %1556 = vst [vmem:[%s594_s17 + $0x38] sm:$0xff] %v1548_v32 }
 0x6e5   : > { %1555 = vst [vmem:[%s594_s17 + $0x30] sm:$0xff] %v1547_v33 }
 0x6e6   : > { %2147 = shalt.err (!%p2144_p3)
}
 0x6e7   : > { %s2148_s1 = scalar_lea.hbm %s2734_s24, 1024  ;;  %s2152_s25 = scalar_lea.hbm %s2838_s21, 2048 }
 0x6e8   : > { %p2149_p4 = scmp.ne.s32.totalorder %s2734_s24, %s2148_s1  ;;  %p2153_p9 = scmp.lt.u32.totalorder %s2734_s24, %s2838_s21 }
 0x6e9   : > { %p2154_p10 = scmp.lt.u32.totalorder %s2152_s25, %s2148_s1  ;;  %p2156_p12 = scmp.lt.u32.totalorder %s2148_s1, %s2734_s24 }
 0x6ea   : > { %p2150_p7 = pnand %p2149_p4, %p2351_p5 }
 0x6eb   : > { %p2155_p11 = por %p2154_p10, %p2153_p9 }
 0x6ec   : > { %p2151_p8 = pneg %p2150_p7 }
 0x6ed   : > { %p2157_p13 = por %p2156_p12, %p2155_p11 }
 0x6ef   : > { %p2158_p0 = pnand %p2157_p13, %p2151_p8 }
 0x6f1   : > { %2161 = shalt.err (!%p2158_p0)
}
 0x6f2   : > { %1991 = dma.vmem_to_hbm [thread:$0]  (%p2351_p5), %s2729_s30, 1024, %s2734_s24, %s1573_s3, %s2213_s23, %s2213_s23, %s2214_s27  }
 0x6f3 PF: > { %s2839_s5 = sld [smem:[#allocation14_spill]]  ;;  %s2840_s6 = sld [smem:[#allocation12_spill]] }
 0x6f9   : > { %p2009_p1 = scmp.ge.s32.totalorder %s2839_s5, 2  ;;  %s1643_s17 = sand.u32 1, %s2840_s6  }
 0x6fa   : > { %s1644_s1 = scalar_lea.sflag [#allocation3], %s1643_s17 }
 0x6fb   : > { %p1997_p2 = pnand %p2009_p1, %p2355_p6 }
 0x6fd   : > { %2179 = dma.done.wait (!%p1997_p2), %s1644_s1, 64  }
 0x6fe   : > { %2181 = vsyncadd (!%p1997_p2), %s1644_s1, 4294967232  ;;  %s2842_s2 = sadd.s32 4294967294, %s2839_s5  }
 0x6ff   : > { %s1652_s18 = sand.u32 1, %s2842_s2  }
 0x700   : > { %s1653_s25 = scalar_lea.sflag [#allocation5], %s1652_s18 }
 0x701   : > { %2183 = dma.done.wait (!%p1997_p2), %s1653_s25, 576  }
 0x702   : > { %2185 = vsyncadd (!%p1997_p2), %s1653_s25, 4294966720  ;;  %s1671_s29 = scalar_lea.sflag [#allocation8], %s1643_s17 }
 0x703   : > { %2187 = dma.done.wait (!%p1997_p2), %s1671_s29, 1024  }
 0x704   : > { %2189 = vsyncadd (!%p1997_p2), %s1671_s29, 4294966272  ;;  %s2843_s30 = sld [smem:[#allocation15_spill]]  ;;  %s2844_s23 = sld [smem:[#allocation13_spill]] }
 0x705   : > { %s2845_s29 = sld [smem:[#allocation16_spill]]  ;;  %s2846_s27 = smov %s2196_s28 }
 0x70a   : > { %p35_p5 = scmp.ge.s32.totalorder %s2843_s30, 4   ;;  %s2847_s28 = smov %s2844_s23 }
 0x70c   :  { %37 = sbr.rel (!%p35_p5) target bundleno = 17 (0x11), region = 164 }
 0x713   :  { %1676 = vsyncpa [#allocation3], 1 }
 0x714   :  { %1678 = vsyncpa [#allocation3 + $0x1], 1 }
 0x715   :  { %1679 = vsyncpa [#allocation5], 1 }
 0x716   :  { %1681 = vsyncpa [#allocation5 + $0x1], 1 }
 0x717   :  { %1682 = vsyncpa [#allocation8], 1 }
 0x718   :  { %1684 = vsyncpa [#allocation8 + $0x1], 1 }

</bundles_post_ra>
